<compile_context>
chip_gen: v6e
topology: v6e:2x2x1
jax: 0.10.0
libtpu: 0.0.40
codegen_flags: <defaults>
</compile_context>

<pallas_src>
import jax
import jax.numpy as jnp
from jax.experimental import pallas as pl
from jax.experimental.pallas import tpu as pltpu


def _round_up(n, m):
    return ((n + m - 1) // m) * m


def blackjack_mlp_kernel(x_ref, w1_ref, b1_ref, w2_ref, b2_ref, w3_ref, b3_ref, o_ref):
    # x_ref: (TILE_B, D_in) bf16 — batch on sublanes as it arrives from HBM.
    # Move batch onto the lane axis for the rest of the kernel. The transpose is done
    # through f32 (most portable 32-bit XLU transpose path); both casts are lossless.
    x_t = x_ref[...].astype(jnp.float32).T.astype(jnp.bfloat16)      # (D_in, TILE_B)

    # fc1 + bias + ReLU  (MXU bf16 x bf16 -> f32 accumulate; epilogue in f32)
    h1 = jnp.dot(w1_ref[...], x_t, preferred_element_type=jnp.float32)
    h1 = jnp.maximum(h1 + b1_ref[...], 0.0)                          # (64, TILE_B) f32
    # dropout(p=0.6): identity in eval mode.
    # TODO(synk): training-mode dropout mask would be generated here with
    #             pltpu.prng_seed + pltpu.prng_random_bits.
    h1 = h1.astype(jnp.bfloat16)

    # fc2 + bias + ReLU
    h2 = jnp.dot(w2_ref[...], h1, preferred_element_type=jnp.float32)
    h2 = jnp.maximum(h2 + b2_ref[...], 0.0)                          # (32, TILE_B) f32
    h2 = h2.astype(jnp.bfloat16)

    # fc3: (1, 32) @ (32, TILE_B) -> (1, TILE_B).  Result already has batch on lanes,
    # so the store below is lane-dense (no 1-lane masked stores).
    out = jnp.dot(w3_ref[...], h2, preferred_element_type=jnp.float32) + b3_ref[...]
    o_ref[...] = out.astype(o_ref.dtype)                             # (1, TILE_B) f32


def blackjack_forward(x, params, *, tile_b=512):
    """x: (B, input_size) float32.  params: PyTorch-shaped weights/biases (f32).

    tile_b: rows of the batch processed per grid step (multiple of 128).  512 is a good
    default per the measured tile sweep; on v7x (64 MiB VMEM, 3.2 TB/s HBM) 1024-2048
    still fits with huge headroom and minimizes per-step overhead.
    """
    B, d_in = x.shape

    # Clamp the tile to the (128-rounded) batch so tiny demo batches don't over-pad.
    tile_b = max(128, min(tile_b, _round_up(B, 128)))
    assert tile_b % 128 == 0
    b_pad = _round_up(B, tile_b)
    num_tiles = b_pad // tile_b

    # bf16 inputs for HBM traffic / MXU; biases stay f32 (epilogue is f32).
    xp = jnp.pad(x, ((0, b_pad - B), (0, 0))).astype(jnp.bfloat16)   # (b_pad, d_in)
    w1 = params["w1"].astype(jnp.bfloat16)                           # (64, d_in)
    w2 = params["w2"].astype(jnp.bfloat16)                           # (32, 64)
    w3 = params["w3"].astype(jnp.bfloat16)                           # (1, 32)
    b1 = params["b1"].reshape(64, 1).astype(jnp.float32)             # column biases:
    b2 = params["b2"].reshape(32, 1).astype(jnp.float32)             # broadcast along
    b3 = params["b3"].reshape(1, 1).astype(jnp.float32)              # the lane (batch) axis

    # Weights / biases: constant index_map -> VMEM-resident across all grid steps.
    const = lambda arr: pl.BlockSpec(arr.shape, lambda i: (0, 0))

    flops = 2 * b_pad * (d_in * 64 + 64 * 32 + 32 * 1)
    bytes_accessed = (
        xp.size * 2                                   # bf16 activations in
        + (w1.size + w2.size + w3.size) * 2           # bf16 weights
        + (b1.size + b2.size + b3.size) * 4           # f32 biases
        + b_pad * 4                                   # f32 output
    )

    out_t = pl.pallas_call(
        blackjack_mlp_kernel,
        out_shape=jax.ShapeDtypeStruct((1, b_pad), jnp.float32),
        grid=(num_tiles,),
        in_specs=[
            pl.BlockSpec((tile_b, d_in), lambda i: (i, 0)),   # streamed batch tile
            const(w1), const(b1), const(w2), const(b2), const(w3), const(b3),
        ],
        out_specs=pl.BlockSpec((1, tile_b), lambda i: (0, i)),  # lane-dense output row
        compiler_params=pltpu.CompilerParams(
            dimension_semantics=("parallel",),        # shard batch grid over TCs (v7x)
        ),
        cost_estimate=pl.CostEstimate(
            flops=flops, transcendentals=0, bytes_accessed=bytes_accessed),
    )(xp, w1, b1, w2, b2, w3, b3)

    # (1, b_pad) -> (B, 1): drop padding rows, restore the PyTorch output shape.
    return out_t[:, :B].reshape(B, 1)


def init_params(key, input_size):
    """Deterministic init mirroring the PyTorch module (PyTorch weight shapes kept).

    fc1: (64, input_size) kaiming normal (relu)  std = sqrt(2 / fan_in)
    fc2: (32, 64)         kaiming normal (relu)
    fc3: (1, 32)          xavier normal          std = sqrt(2 / (fan_in + fan_out))
    biases: nn.Linear default U(-1/sqrt(fan_in), 1/sqrt(fan_in))
    """
    k1, k2, k3, kb1, kb2, kb3 = jax.random.split(key, 6)

    std1 = (2.0 / input_size) ** 0.5
    std2 = (2.0 / 64) ** 0.5
    std3 = (2.0 / (32 + 1)) ** 0.5

    w1 = jax.random.normal(k1, (64, input_size), jnp.float32) * std1
    w2 = jax.random.normal(k2, (32, 64), jnp.float32) * std2
    w3 = jax.random.normal(k3, (1, 32), jnp.float32) * std3

    bnd1 = 1.0 / (input_size ** 0.5)
    bnd2 = 1.0 / (64 ** 0.5)
    bnd3 = 1.0 / (32 ** 0.5)
    b1 = jax.random.uniform(kb1, (64,), jnp.float32, -bnd1, bnd1)
    b2 = jax.random.uniform(kb2, (32,), jnp.float32, -bnd2, bnd2)
    b3 = jax.random.uniform(kb3, (1,), jnp.float32, -bnd3, bnd3)

    return {"w1": w1, "b1": b1, "w2": w2, "b2": b2, "w3": w3, "b3": b3}


def reference_forward(x, params):
    """Pure-JAX reference mirroring the kernel's bf16-operand / f32-accumulate numerics."""
    f32 = jnp.float32
    bf = lambda a: a.astype(jnp.bfloat16).astype(f32)
    h1 = jnp.maximum(bf(x) @ bf(params["w1"]).T + params["b1"].astype(f32), 0.0)
    h1 = bf(h1)
    h2 = jnp.maximum(h1 @ bf(params["w2"]).T + params["b2"].astype(f32), 0.0)
    h2 = bf(h2)
    return h2 @ bf(params["w3"]).T + params["b3"].astype(f32)


if __name__ == "__main__":
    key = jax.random.PRNGKey(0)
    kx, kp = jax.random.split(key)

    batch = 8
    input_size = 16  # blackjack feature vector (player sum, dealer card, usable ace, ...)

    x = jax.random.normal(kx, (batch, input_size), jnp.float32)
    params = init_params(kp, input_size)

    out = blackjack_forward(x, params)
    out = jax.block_until_ready(out)

    ref = reference_forward(x, params)
    assert out.shape == (batch, 1), out.shape
    assert jnp.allclose(out, ref, atol=5e-3, rtol=5e-3), "mismatch vs reference"

    print("KERNEL_OK")
</pallas_src>

<mosaic_0001>
module attributes {stable_mosaic.version = 11 : i64} {
  func.func @blackjack_mlp_kernel(%arg0: i32, %arg1: memref<128x16xbf16, #tpu.memory_space<vmem>>, %arg2: memref<64x16xbf16, #tpu.memory_space<vmem>>, %arg3: memref<64x1xf32, #tpu.memory_space<vmem>>, %arg4: memref<32x64xbf16, #tpu.memory_space<vmem>>, %arg5: memref<32x1xf32, #tpu.memory_space<vmem>>, %arg6: memref<1x32xbf16, #tpu.memory_space<vmem>>, %arg7: memref<1x1xf32, #tpu.memory_space<vmem>>, %arg8: memref<1x128xf32, #tpu.memory_space<vmem>>) attributes {dimension_semantics = [#tpu.dimension_semantics<parallel>], iteration_bounds = array<i64: 1>, scalar_prefetch = 0 : i64, scratch_operands = 0 : i64, tpu.core_type = #tpu.core_type<tc>, window_params = [{transform_indices = @transform_0, window_bounds = array<i64: 128, 16>}, {pipeline_mode = #tpu.pipeline_mode<synchronous>, transform_indices = @transform_1, window_bounds = array<i64: 64, 16>}, {pipeline_mode = #tpu.pipeline_mode<synchronous>, transform_indices = @transform_2, window_bounds = array<i64: 64, 1>}, {pipeline_mode = #tpu.pipeline_mode<synchronous>, transform_indices = @transform_3, window_bounds = array<i64: 32, 64>}, {pipeline_mode = #tpu.pipeline_mode<synchronous>, transform_indices = @transform_4, window_bounds = array<i64: 32, 1>}, {pipeline_mode = #tpu.pipeline_mode<synchronous>, transform_indices = @transform_5, window_bounds = array<i64: 1, 32>}, {pipeline_mode = #tpu.pipeline_mode<synchronous>, transform_indices = @transform_6, window_bounds = array<i64: 1, 1>}, {transform_indices = @transform_7, window_bounds = array<i64: 1, 128>}]} {
    %c0 = arith.constant 0 : index
    %c0_0 = arith.constant 0 : index
    %0 = vector.load %arg1[%c0, %c0_0] : memref<128x16xbf16, #tpu.memory_space<vmem>>, vector<128x16xbf16>
    %1 = arith.extf %0 : vector<128x16xbf16> to vector<128x16xf32>
    %2 = tpu.transpose %1, [1, 0] : vector<128x16xf32> -> vector<16x128xf32>
    %3 = arith.truncf %2 : vector<16x128xf32> to vector<16x128xbf16>
    %c0_1 = arith.constant 0 : index
    %c0_2 = arith.constant 0 : index
    %4 = vector.load %arg2[%c0_1, %c0_2] : memref<64x16xbf16, #tpu.memory_space<vmem>>, vector<64x16xbf16>
    %cst = arith.constant dense<0.000000e+00> : vector<64x128xf32>
    %5 = tpu.matmul %4, %3, %cst {dimension_numbers = #tpu.dot_dimension_numbers<[1], [0], [0], [1], [0, 0, 1, 1], [], []>} : vector<64x16xbf16>, vector<16x128xbf16>, vector<64x128xf32> -> vector<64x128xf32>
    %c0_3 = arith.constant 0 : index
    %c0_4 = arith.constant 0 : index
    %6 = vector.load %arg3[%c0_3, %c0_4] : memref<64x1xf32, #tpu.memory_space<vmem>>, vector<64x1xf32>
    %7 = vector.broadcast %6 : vector<64x1xf32> to vector<64x128xf32>
    %8 = arith.addf %5, %7 : vector<64x128xf32>
    %cst_5 = arith.constant 0.000000e+00 : f32
    %9 = vector.broadcast %cst_5 : f32 to vector<64x128xf32>
    %10 = arith.maximumf %8, %9 : vector<64x128xf32>
    %11 = arith.truncf %10 : vector<64x128xf32> to vector<64x128xbf16>
    %c0_6 = arith.constant 0 : index
    %c0_7 = arith.constant 0 : index
    %12 = vector.load %arg4[%c0_6, %c0_7] : memref<32x64xbf16, #tpu.memory_space<vmem>>, vector<32x64xbf16>
    %cst_8 = arith.constant dense<0.000000e+00> : vector<32x128xf32>
    %13 = tpu.matmul %12, %11, %cst_8 {dimension_numbers = #tpu.dot_dimension_numbers<[1], [0], [0], [1], [0, 0, 1, 1], [], []>} : vector<32x64xbf16>, vector<64x128xbf16>, vector<32x128xf32> -> vector<32x128xf32>
    %c0_9 = arith.constant 0 : index
    %c0_10 = arith.constant 0 : index
    %14 = vector.load %arg5[%c0_9, %c0_10] : memref<32x1xf32, #tpu.memory_space<vmem>>, vector<32x1xf32>
    %15 = vector.broadcast %14 : vector<32x1xf32> to vector<32x128xf32>
    %16 = arith.addf %13, %15 : vector<32x128xf32>
    %cst_11 = arith.constant 0.000000e+00 : f32
    %17 = vector.broadcast %cst_11 : f32 to vector<32x128xf32>
    %18 = arith.maximumf %16, %17 : vector<32x128xf32>
    %19 = arith.truncf %18 : vector<32x128xf32> to vector<32x128xbf16>
    %c0_12 = arith.constant 0 : index
    %c0_13 = arith.constant 0 : index
    %20 = vector.load %arg6[%c0_12, %c0_13] : memref<1x32xbf16, #tpu.memory_space<vmem>>, vector<1x32xbf16>
    %cst_14 = arith.constant dense<0.000000e+00> : vector<1x128xf32>
    %21 = tpu.matmul %20, %19, %cst_14 {dimension_numbers = #tpu.dot_dimension_numbers<[1], [0], [0], [1], [0, 0, 1, 1], [], []>} : vector<1x32xbf16>, vector<32x128xbf16>, vector<1x128xf32> -> vector<1x128xf32>
    %c0_15 = arith.constant 0 : index
    %c0_16 = arith.constant 0 : index
    %22 = vector.load %arg7[%c0_15, %c0_16] : memref<1x1xf32, #tpu.memory_space<vmem>>, vector<1x1xf32>
    %23 = vector.broadcast %22 : vector<1x1xf32> to vector<1x128xf32>
    %24 = arith.addf %21, %23 : vector<1x128xf32>
    %c0_17 = arith.constant 0 : index
    %c0_18 = arith.constant 0 : index
    %25 = vector.load %arg8[%c0_17, %c0_18] : memref<1x128xf32, #tpu.memory_space<vmem>>, vector<1x128xf32>
    tpu.vector_store %arg8[%c0_17, %c0_18], %24 {strides = array<i32>} : memref<1x128xf32, #tpu.memory_space<vmem>>, vector<1x128xf32>,
    return
  }
  func.func @transform_0(%arg0: i32) -> (i32, i32) {
    %c0_i32 = arith.constant 0 : i32
    %c0_i32_0 = arith.constant 0 : i32
    return %arg0, %c0_i32 : i32, i32
  }
  func.func @transform_1(%arg0: i32) -> (i32, i32) {
    %c0_i32 = arith.constant 0 : i32
    %c0_i32_0 = arith.constant 0 : i32
    %c0_i32_1 = arith.constant 0 : i32
    return %c0_i32, %c0_i32_0 : i32, i32
  }
  func.func @transform_2(%arg0: i32) -> (i32, i32) {
    %c0_i32 = arith.constant 0 : i32
    %c0_i32_0 = arith.constant 0 : i32
    %c0_i32_1 = arith.constant 0 : i32
    return %c0_i32, %c0_i32_0 : i32, i32
  }
  func.func @transform_3(%arg0: i32) -> (i32, i32) {
    %c0_i32 = arith.constant 0 : i32
    %c0_i32_0 = arith.constant 0 : i32
    %c0_i32_1 = arith.constant 0 : i32
    return %c0_i32, %c0_i32_0 : i32, i32
  }
  func.func @transform_4(%arg0: i32) -> (i32, i32) {
    %c0_i32 = arith.constant 0 : i32
    %c0_i32_0 = arith.constant 0 : i32
    %c0_i32_1 = arith.constant 0 : i32
    return %c0_i32, %c0_i32_0 : i32, i32
  }
  func.func @transform_5(%arg0: i32) -> (i32, i32) {
    %c0_i32 = arith.constant 0 : i32
    %c0_i32_0 = arith.constant 0 : i32
    %c0_i32_1 = arith.constant 0 : i32
    return %c0_i32, %c0_i32_0 : i32, i32
  }
  func.func @transform_6(%arg0: i32) -> (i32, i32) {
    %c0_i32 = arith.constant 0 : i32
    %c0_i32_0 = arith.constant 0 : i32
    %c0_i32_1 = arith.constant 0 : i32
    return %c0_i32, %c0_i32_0 : i32, i32
  }
  func.func @transform_7(%arg0: i32) -> (i32, i32) {
    %c0_i32 = arith.constant 0 : i32
    %c0_i32_0 = arith.constant 0 : i32
    return %c0_i32, %arg0 : i32, i32
  }
}

</mosaic_0001>

<bundles_post_ra>
// kernel: tpu_custom_call.1
= control target key start
LH: loop header
LB: loop body
LE: loop exit
PB: predicated region body
PF: predicated region fallthrough
CT: control target
= control target key end

     0   :  { %s698_s0 = inlined_call_operand.vmem [shape: bf16[128,16], index: 0, kind: input, shape index: {}]   ;;  %s699_s1 = inlined_call_operand.vmem [shape: bf16[64,16], index: 1, kind: input, shape index: {}]   ;;  %s700_s2 = inlined_call_operand.vmem [shape: f32[64,1], index: 2, kind: input, shape index: {}]   ;;  %s701_s3 = inlined_call_operand.vmem [shape: bf16[32,64], index: 3, kind: input, shape index: {}]   ;;  %s702_s4 = inlined_call_operand.vmem [shape: f32[32,1], index: 4, kind: input, shape index: {}]   ;;  %s703_s5 = inlined_call_operand.vmem [shape: bf16[1,32], index: 5, kind: input, shape index: {}]   ;;  %s704_s6 = inlined_call_operand.<no memory space> [shape: f32[1,1], index: 6, kind: input, shape index: {}]   ;;  %s705_s7 = inlined_call_operand.hbm [shape: f32[1,128], index: 7, kind: output, shape index: {}]  }
   0x1   :  { %v12_v0 = vstv %s704_s6 }
   0x2   :  { %13 = vst [vmem:[#allocation2] sm:$0x1] %v12_v0 }
   0x3   :  { %v445_v1 = vld [vmem:[%s698_s0] sm:$0xff]   ;;  %v476_v4 = vld [vmem:[%s698_s0 + $0x8] sm:$0xff]   ;;  %vm171_vm0 = vcmask 130048  }
   0x4   :  { %v446_v2 = vunpack.c.l.bf16 %v445_v1  ;;  %v447_v3 = vunpack.c.h.bf16 %v445_v1  ;;  %v450_v5 = vunpack.c.l.bf16 %v476_v4  ;;  %v533_v6 = vld [vmem:[%s699_s1] sm:$0xff]  }
   0x6   :  { %62 = vxpose.xlu0.b32.start [1/16] (narrow) %v446_v2, 16 }
   0xa   :  { %63 = vxpose.xlu0.b32.cont [2/16] (narrow) %v447_v3, 16 }
   0xb   :  { %14 = vsyncpa [#allocation4], 0  ;;  %499 = vmatprep.mubr.msk.bf16.mxu0 %vm171_vm0, %v533_v6  ;;  %v451_v7 = vunpack.c.h.bf16 %v476_v4  ;;  %v477_v8 = vld [vmem:[%s698_s0 + $0x10] sm:$0xff]   ;;  %v561_v12 = vmov 0   ;;  %v478_v13 = vld [vmem:[%s698_s0 + $0x18] sm:$0xff]   ;;  %vm299_vm1 = vcmask 523264  }
   0xc   :  { %v454_v9 = vunpack.c.l.bf16 %v477_v8  ;;  %v109_v10 = vld [vmem:[%s700_s2 + $0x30] sm:$0xff]  ;;  %v455_v11 = vunpack.c.h.bf16 %v477_v8  ;;  %531 = vset.pattern.permute.xlu1 %v561_v12  ;;  %v110_v14 = vld [vmem:[%s700_s2 + $0x38] sm:$0xff]  ;;  %v458_v15 = vunpack.c.l.bf16 %v478_v13  ;;  %v107_v16 = vld [vmem:[%s700_s2 + $0x20] sm:$0xff]  ;;  %v459_v17 = vunpack.c.h.bf16 %v478_v13  ;;  %s564_s27 = smov [#allocation3]  }
   0xd   :  { %143 = vperm.xlu1 %531, %v109_v10   ;;  %v479_v18 = vld [vmem:[%s698_s0 + $0x20] sm:$0xff]   ;;  %v108_v19 = vld [vmem:[%s700_s2 + $0x28] sm:$0xff]  ;;  %v105_v21 = vld [vmem:[%s700_s2 + $0x10] sm:$0xff]  ;;  %vm563_vm2 = vmmov 0   ;;  %vm372_vm3 = vcmask 261120   ;;  %s423_s28 = sshll.u32 %s564_s27, 4  ;;  %s424_s28 = int_to_ptr.vmem [resolvable:$true] %s423_s28 }
   0xe   :  { %64 = vxpose.xlu0.b32.cont [3/16] (narrow) %v450_v5, 16  ;;  %v462_v20 = vunpack.c.l.bf16 %v479_v18  ;;  %v463_v22 = vunpack.c.h.bf16 %v479_v18  ;;  %v480_v23 = vld [vmem:[%s698_s0 + $0x28] sm:$0xff]   ;;  %v106_v24 = vld [vmem:[%s700_s2 + $0x18] sm:$0xff]  ;;  %v103_v26 = vld [vmem:[%s700_s2] sm:$0xff]  ;;  %s539_s29 = scalar_lea.vmem %s424_s28, 16  ;;  %s543_s30 = scalar_lea.vmem %s424_s28, 32 }
   0xf   :  { %v466_v25 = vunpack.c.l.bf16 %v480_v23  ;;  %v467_v27 = vunpack.c.h.bf16 %v480_v23  ;;  %v481_v28 = vld [vmem:[%s698_s0 + $0x30] sm:$0xff]   ;;  %v104_v29 = vld [vmem:[%s700_s2 + $0x8] sm:$0xff]  ;;  %v482_v33 = vld [vmem:[%s698_s0 + $0x38] sm:$0xff]   ;;  %p540_p0 = scmp.ne.s32.totalorder %s424_s28, %s539_s29  ;;  %p544_p1 = scmp.lt.s32.totalorder %s424_s28, %s424_s28 }
  0x10   :  { %v470_v30 = vunpack.c.l.bf16 %v481_v28  ;;  %v267_v31 = vld [vmem:[%s702_s4 + $0x10] sm:$0xff]  ;;  %v471_v32 = vunpack.c.h.bf16 %v481_v28  ;;  %v268_v34 = vld [vmem:[%s702_s4 + $0x18] sm:$0xff]  ;;  %v474_v35 = vunpack.c.l.bf16 %v482_v33  ;;  %v265_v36 = vld [vmem:[%s702_s4] sm:$0xff]  ;;  %v475_v37 = vunpack.c.h.bf16 %v482_v33  ;;  %p545_p2 = scmp.lt.s32.totalorder %s543_s30, %s539_s29 }
  0x11   :  { %148 = vperm.xlu1 %531, %v110_v14   ;;  %v266_v38 = vld [vmem:[%s702_s4 + $0x8] sm:$0xff]  ;;  %v362_v39 = vld [vmem:[#allocation2] sm:$0x1]  ;;  %v535_v44 = vld [vmem:[%s699_s1 + $0x10] sm:$0xff]  }
  0x12   :  { %65 = vxpose.xlu0.b32.cont [4/16] (narrow) %v451_v7, 16  ;;  %v534_v43 = vld [vmem:[%s699_s1 + $0x8] sm:$0xff]   ;;  %v536_v45 = vld [vmem:[%s699_s1 + $0x18] sm:$0xff]   ;;  %v537_v46 = vld [vmem:[%s701_s3] sm:$0xff]   ;;  %p546_p3 = por %p545_p2, %p544_p1 }
  0x13   :  { %515 = vmatprep.mubr.msk.bf16.mxu1 %vm299_vm1, %v537_v46 }
  0x14   :  { %p547_p4 = pnand %p546_p3, %p540_p0 }
  0x15   :  { %133 = vperm.xlu1 %531, %v107_v16  }
  0x16   :  { %66 = vxpose.xlu0.b32.cont [5/16] (narrow) %v454_v9, 16 }
  0x19   :  { %138 = vperm.xlu1 %531, %v108_v19   ;;  %v538_v19 = vld [vmem:[%s701_s3 + $0x8] sm:$0xff]  }
  0x1a   :  { %67 = vxpose.xlu0.b32.cont [6/16] (narrow) %v455_v11, 16 }
  0x1d   :  { %123 = vperm.xlu1 %531, %v105_v21  }
  0x1e   :  { %68 = vxpose.xlu0.b32.cont [7/16] (narrow) %v458_v15, 16 }
  0x21   :  { %128 = vperm.xlu1 %531, %v106_v24  }
  0x22   :  { %69 = vxpose.xlu0.b32.cont [8/16] (narrow) %v459_v17, 16 }
  0x25   :  { %113 = vperm.xlu1 %531, %v103_v26  }
  0x26   :  { %70 = vxpose.xlu0.b32.cont [9/16] (narrow) %v462_v20, 16  ;;  %v562_v20 = vmov 0.0  }
  0x29   :  { %118 = vperm.xlu1 %531, %v104_v29  }
  0x2a   :  { %71 = vxpose.xlu0.b32.cont [10/16] (narrow) %v463_v22, 16 }
  0x2d   :  { %281 = vperm.xlu1 %531, %v267_v31  }
  0x2e   :  { %72 = vxpose.xlu0.b32.cont [11/16] (narrow) %v466_v25, 16 }
  0x31   :  { %286 = vperm.xlu1 %531, %v268_v34  }
  0x32   :  { %73 = vxpose.xlu0.b32.cont [12/16] (narrow) %v467_v27, 16 }
  0x35   :  { %271 = vperm.xlu1 %531, %v265_v36  }
  0x36   :  { %74 = vxpose.xlu0.b32.cont [13/16] (narrow) %v470_v30, 16 }
  0x39   :  { %276 = vperm.xlu1 %531, %v266_v38  }
  0x3a   :  { %75 = vxpose.xlu0.b32.cont [14/16] (narrow) %v471_v32, 16 }
  0x3d   :  { %365 = vperm.xlu1 %531, %v362_v39   ;;  %v361_v39 = vld [vmem:[%s703_s5] sm:$0x1] }
  0x3e   :  { %76 = vxpose.xlu0.b32.cont [15/16] (narrow) %v474_v35, 16 }
  0x42   :  { %77 = vxpose.xlu0.b32.end [16/16] (narrow) %v475_v37, 16 }
  0x6b   :  { %532 = vset.pattern.permute.xlu0 %v561_v12 }
  0x82   :  { %v78_v40 = vpop.trf.xlu0 }
  0x86   :  { %v79_v41 = vpop.trf.xlu0 }
  0x87   :  { %v94_v42 = vpack.c.bf16 %v79_v41, %v78_v40  ;;  %v368_v40 = vlaneseq }
  0x88   :  { %v144_v47 = vpop.permute.xlu1 %143 }
  0x89   :  { %497 = vmatprep.subr.bf16.mxu0 %v94_v42  ;;  %v369_v41 = vshrl.u32 %v368_v40, 7 }
  0x8a   :  { %498 = vmatpush3.bf16.msra.mxu0 %v94_v42 }
  0x8b   :  { %519 = vmatprep.subr.bf16.mxu0 %v562_v20  ;;  %v370_v42 = vsub.s32 0, %v369_v41 }
  0x8c   :  { %v149_v48 = vpop.permute.xlu1 %148 }
  0x8d   :  { %500 = vmatmul.mubr.msk.bf16.vlgmr.msra.gmra.mxu0 %vm171_vm0, %v534_v43 }
  0x8e   :  { %503 = vmatprep.mubr.msk.bf16.mxu0 %vm171_vm0, %v535_v44 }
  0x90   :  { %v134_v49 = vpop.permute.xlu1 %133 }
  0x94   :  { %v139_v50 = vpop.permute.xlu1 %138 }
  0x95   :  { %504 = vmatmul.mubr.msk.bf16.gmra.mxu0 %vm171_vm0, %v536_v45 }
  0x96   :  { %523 = vmatprep.mubr.msk.bf16.mxu0 %vm563_vm2, %v562_v20 }
  0x98   :  { %v124_v51 = vpop.permute.xlu1 %123 }
  0x9c   :  { %v129_v55 = vpop.permute.xlu1 %128 }
  0xa0   :  { %v114_v60 = vpop.permute.xlu1 %113 }
  0xa4   :  { %v119_v9 = vpop.permute.xlu1 %118 }
  0xa8   :  { %v282_v21 = vpop.permute.xlu1 %281 }
  0xac   :  { %v287_v22 = vpop.permute.xlu1 %286 }
  0xb0   :  { %v272_v23 = vpop.permute.xlu1 %271 }
  0xb4   :  { %v277_v29 = vpop.permute.xlu1 %276 }
  0xb8   :  { %v366_v43 = vpop.permute.xlu1 %365 }
  0xb9   :  { %v371_v44 = vrot.slane %v366_v43, %v370_v42 }
 0x14d   :  { %v501_v52 = vpop.f32.mrf.mxu0 }
 0x14e   :  { %v227_v5 = vadd.f32 %v501_v52, %v124_v51 }
 0x14f   :  { %v218_v53 = vpop.f32.mrf.mxu0 }
 0x150   :  { %v251_v13 = vmax.f32 %v227_v5, 0.0  ;;  %v219_v14 = vadd.f32 %v218_v53, %v114_v60 }
 0x151   :  { %v502_v54 = vpop.f32.mrf.mxu0 }
 0x152   :  { %v230_v1 = vadd.f32 %v502_v54, %v129_v55  ;;  %v249_v17 = vmax.f32 %v219_v14, 0.0 }
 0x153   :  { %v221_v56 = vpop.f32.mrf.mxu0 }
 0x154   :  { %v252_v10 = vmax.f32 %v230_v1, 0.0  ;;  %v222_v11 = vadd.f32 %v221_v56, %v119_v9 }
 0x155   :  { %v505_v57 = vpop.f32.mrf.mxu0 }
 0x156   :  { %v243_v59 = vadd.f32 %v505_v57, %v144_v47  ;;  %v258_v15 = vpack.c.bf16 %v252_v10, %v251_v13  ;;  %v250_v16 = vmax.f32 %v222_v11, 0.0 }
 0x157   :  { %v234_v58 = vpop.f32.mrf.mxu0 }
 0x158   :  { %v235_v62 = vadd.f32 %v234_v58, %v134_v49  ;;  %v255_v2 = vmax.f32 %v243_v59, 0.0  ;;  %v257_v18 = vpack.c.bf16 %v250_v16, %v249_v17 }
 0x159   :  { %v506_v61 = vpop.f32.mrf.mxu0 }
 0x15a   :  { %v246_v63 = vadd.f32 %v506_v61, %v149_v48  ;;  %v253_v6 = vmax.f32 %v235_v62, 0.0 }
 0x15b   :  { %v237_v0 = vpop.f32.mrf.mxu0 }
 0x15c   :  { %v256_v3 = vmax.f32 %v246_v63, 0.0  ;;  %v238_v4 = vadd.f32 %v237_v0, %v139_v50 }
 0x15e   :  { %v254_v7 = vmax.f32 %v238_v4, 0.0  ;;  %v260_v8 = vpack.c.bf16 %v256_v3, %v255_v2 }
 0x160   :  { %v259_v12 = vpack.c.bf16 %v254_v7, %v253_v6  ;;  %507 = vmatprep.subr.bf16.mxu1 %v260_v8 }
 0x161   :  { %508 = vmatpush3.bf16.msra.mxu1 %v260_v8 }
 0x162   :  { %509 = vmatprep.subr.bf16.mxu1 %v259_v12 }
 0x165   :  { %510 = vmatpush3.bf16.msra.mxu1 %v259_v12 }
 0x166   :  { %511 = vmatprep.subr.bf16.mxu1 %v258_v15 }
 0x169   :  { %512 = vmatpush3.bf16.msra.mxu1 %v258_v15 }
 0x16a   :  { %513 = vmatprep.subr.bf16.mxu1 %v257_v18 }
 0x16d   :  { %514 = vmatpush3.bf16.msra.mxu1 %v257_v18 }
 0x170   :  { %516 = vmatmul.mubr.msk.bf16.vlgmr.msra.gmra.mxu1 %vm299_vm1, %v538_v19 }
 0x230   :  { %v517_v24 = vpop.f32.mrf.mxu1 }
 0x231   :  { %v349_v26 = vadd.f32 %v517_v24, %v282_v21 }
 0x232   :  { %v340_v25 = vpop.f32.mrf.mxu1 }
 0x233   :  { %v357_v31 = vmax.f32 %v349_v26, 0.0  ;;  %v341_v32 = vadd.f32 %v340_v25, %v272_v23 }
 0x234   :  { %v518_v27 = vpop.f32.mrf.mxu1 }
 0x235   :  { %v352_v28 = vadd.f32 %v518_v27, %v287_v22  ;;  %v355_v37 = vmax.f32 %v341_v32, 0.0 }
 0x236   :  { %v343_v30 = vpop.f32.mrf.mxu1 }
 0x237   :  { %v358_v33 = vmax.f32 %v352_v28, 0.0  ;;  %v344_v34 = vadd.f32 %v343_v30, %v277_v29 }
 0x239   :  { %v360_v35 = vpack.c.bf16 %v358_v33, %v357_v31  ;;  %v356_v36 = vmax.f32 %v344_v34, 0.0 }
 0x23b   :  { %520 = vmatpush3.bf16.msra.mxu0 %v360_v35  ;;  %v359_v38 = vpack.c.bf16 %v356_v36, %v355_v37 }
 0x23c   :  { %521 = vmatprep.subr.bf16.mxu0 %v562_v20 }
 0x23f   :  { %522 = vmatpush3.bf16.msra.mxu0 %v359_v38 }
 0x242   :  { %524 = vmatmul.mubr.msk.bf16.vlgmr.msra.gmra.mxu0 %vm372_vm3, %v361_v39 }
 0x302   :  { %v410_v45 = vpop.f32.mrf.mxu0 }
 0x303   :  { %v411_v46 = vadd.f32 %v410_v45, %v371_v44 }
 0x304   :  { %v525_v47 = vpop.f32.mrf.mxu0 }
 0x305   :  { %416 = vst [vmem:[#allocation3] sm:$0x1] %v411_v46 }
 0x306   :  { %v413_v48 = vpop.f32.mrf.mxu0 }
 0x307   :  { %550 = shalt.err (!%p547_p4)
}
 0x308   :  { %426 = dma.vmem_to_hbm [thread:$0]  %s424_s28, 16, %s705_s7, [#allocation4]   ;;  %v526_v49 = vpop.f32.mrf.mxu0 }
 0x309   :  { %559 = dma.done.wait [#allocation4], 16  }
 0x30a   :  { %560 = vsyncadd [#allocation4], 4294967280 }
 0x30b   :  { %430 = vsyncpa [#allocation4], 1 }

</bundles_post_ra>
